<compile_context>
chip_gen: v7x
topology: tpu7x:2x2x1
jax: 0.10.0
libtpu: 0.0.40
codegen_flags: <defaults>
</compile_context>

<pallas_src>
import functools

import jax
import jax.numpy as jnp
from jax.experimental import pallas as pl
from jax.experimental.pallas import tpu as pltpu

BN_EPS = 1e-5
_INV_SQRT2 = 0.7071067811865476


def _gelu_exact(h):
    # nn.GELU() default: 0.5 * x * (1 + erf(x / sqrt(2)))
    return 0.5 * h * (1.0 + jax.lax.erf(h * _INV_SQRT2))


def _round_up(n, m):
    return (n + m - 1) // m * m


def _fold_bn_linear(w, b, gamma, beta, mean, var):
    """Fold eval-mode BatchNorm into the preceding Linear (exact)."""
    s = gamma * jax.lax.rsqrt(var + BN_EPS)        # (1, out)
    return w * s, (b - mean) * s + beta            # (in, out), (1, out)


def _pad2(a, rows, cols):
    out = jnp.zeros((rows, cols), a.dtype)
    return out.at[:a.shape[0], :a.shape[1]].set(a)


# --------------------------- one-time parameter prep -------------------------

def prepare_resnet_params(blocks_params, head_w, head_b, weight_dtype=jnp.bfloat16):
    """Fold BN, zero-pad to (sublane, lane) multiples, cast weights to bf16,
    pack all biases into one fp32 array.  Run ONCE, not per forward call.

    Returns (weights: list[bf16 2-D], bias_pack: f32 (nb, max_pad), meta: static tuple).
    """
    in_dim = blocks_params[0]["w1"].shape[0]
    num_classes = head_w.shape[1]
    fpad = lambda d: _round_up(d, 128)

    weights, biases, has_proj, out_pads = [], [], [], []
    cur_in_pad = fpad(in_dim)

    for p in blocks_params:
        dout = p["w1"].shape[1]
        dpad = fpad(dout)
        w1, b1 = _fold_bn_linear(p["w1"], p["b1"], p["g1"], p["be1"], p["m1"], p["v1"])
        w2, b2 = _fold_bn_linear(p["w2"], p["b2"], p["g2"], p["be2"], p["m2"], p["v2"])
        weights += [_pad2(w1, cur_in_pad, dpad).astype(weight_dtype),
                    _pad2(w2, dpad, dpad).astype(weight_dtype)]
        biases += [(b1, dpad), (b2, dpad)]
        if "wp" in p:
            wp, bp = _fold_bn_linear(p["wp"], p["bp"], p["gp"], p["bep"], p["mp"], p["vp"])
            weights.append(_pad2(wp, cur_in_pad, dpad).astype(weight_dtype))
            biases.append((bp, dpad))
            has_proj.append(True)
        else:
            has_proj.append(False)
        out_pads.append(dpad)
        cur_in_pad = dpad

    nc_pad = fpad(num_classes)
    weights.append(_pad2(head_w, cur_in_pad, nc_pad).astype(weight_dtype))
    biases.append((head_b, nc_pad))

    max_pad = max(dp for _, dp in biases)
    nb = len(biases)
    bias_pack = jnp.zeros((_round_up(nb, 8), max_pad), jnp.float32)
    for r, (b, _) in enumerate(biases):
        bias_pack = bias_pack.at[r, : b.shape[1]].set(b[0].astype(jnp.float32))

    meta = (in_dim, fpad(in_dim), num_classes, nc_pad, tuple(has_proj), tuple(out_pads))
    return weights, bias_pack, meta


# --------------------------- fused Pallas kernel -----------------------------

def _resnet_fused_kernel(has_proj, out_pads, nc_pad, x_ref, *refs):
    """One batch tile through the whole network (all blocks + head).

    refs layout: per-layer weights (bf16) ..., bias_pack (f32), out_ref.
    """
    *w_refs, bias_ref, o_ref = refs
    bias_all = bias_ref[...]          # (nb_pad, max_pad) f32, loaded once
    x = x_ref[...]                    # (TM, in_pad) f32

    wi = 0
    bi = 0
    for hp, dpad in zip(has_proj, out_pads):
        xb = x.astype(jnp.bfloat16)
        w1 = w_refs[wi][...]
        w2 = w_refs[wi + 1][...]
        b1 = bias_all[bi:bi + 1, :dpad]
        b2 = bias_all[bi + 1:bi + 2, :dpad]
        wi += 2
        bi += 2
        if hp:
            wp = w_refs[wi][...]
            bp = bias_all[bi:bi + 1, :dpad]
            wi += 1
            bi += 1
            identity = jnp.dot(xb, wp, preferred_element_type=jnp.float32) + bp
        else:
            identity = x
        # linear1(+bn1 folded) -> gelu -> dropout(id) -> linear2(+bn2) -> gelu
        h = _gelu_exact(jnp.dot(xb, w1, preferred_element_type=jnp.float32) + b1)
        h = _gelu_exact(jnp.dot(h.astype(jnp.bfloat16), w2,
                                preferred_element_type=jnp.float32) + b2)
        # residual add + final activation
        x = _gelu_exact(h + identity)

    wh = w_refs[wi][...]
    bh = bias_all[bi:bi + 1, :nc_pad]
    o_ref[...] = (jnp.dot(x.astype(jnp.bfloat16), wh,
                          preferred_element_type=jnp.float32) + bh).astype(o_ref.dtype)


# --------------------------------- wrapper -----------------------------------

def resnet_forward(x, weights, bias_pack, meta, batch_tile=256):
    """Run the fused network on pre-folded / pre-padded bf16 parameters."""
    in_dim, in_pad, num_classes, nc_pad, has_proj, out_pads = meta
    B = x.shape[0]
    tm = min(batch_tile, _round_up(B, 8))
    B_pad = _round_up(B, tm)
    x_pad = _pad2(x.astype(jnp.float32), B_pad, in_pad)

    # VMEM budget: all weights resident + double-buffered x/out tiles + live
    # per-block intermediates.
    weight_bytes = sum(int(w.size) * w.dtype.itemsize for w in weights)
    weight_bytes += int(bias_pack.size) * bias_pack.dtype.itemsize
    if weight_bytes > 48 * 1024 * 1024:
        # TODO(synk): per-block weight streaming (pl.ANY + make_async_copy) needed.
        raise NotImplementedError("folded weights exceed VMEM-resident budget")
    max_pad = max(out_pads + (in_pad, nc_pad))
    vmem_needed = (weight_bytes
                   + 2 * (tm * in_pad * 4 + tm * nc_pad * 4)   # pipelined x / out
                   + 6 * tm * max_pad * 4                      # live intermediates
                   + (2 << 20))                                # headroom
    vmem_limit = int(min(max(vmem_needed, 32 << 20), 64 << 20))

    # advisory cost estimate
    flops = 0
    cur = in_pad
    for hp, dpad in zip(has_proj, out_pads):
        flops += 2 * B_pad * (cur * dpad + dpad * dpad)
        if hp:
            flops += 2 * B_pad * cur * dpad
        cur = dpad
    flops += 2 * B_pad * cur * nc_pad
    transcendentals = 3 * B_pad * sum(out_pads)
    bytes_accessed = weight_bytes + B_pad * (in_pad + nc_pad) * 4

    in_specs = [pl.BlockSpec((tm, in_pad), lambda i: (i, 0))]
    for w in weights:
        in_specs.append(pl.BlockSpec(w.shape, lambda i: (0, 0)))   # VMEM-resident
    in_specs.append(pl.BlockSpec(bias_pack.shape, lambda i: (0, 0)))
    out_specs = pl.BlockSpec((tm, nc_pad), lambda i: (i, 0))

    kernel = functools.partial(_resnet_fused_kernel, has_proj, out_pads, nc_pad)
    out_padded = pl.pallas_call(
        kernel,
        out_shape=jax.ShapeDtypeStruct((B_pad, nc_pad), jnp.float32),
        grid=(B_pad // tm,),
        in_specs=in_specs,
        out_specs=out_specs,
        compiler_params=pltpu.CompilerParams(
            dimension_semantics=("parallel",),
            vmem_limit_bytes=vmem_limit),
        cost_estimate=pl.CostEstimate(flops=int(flops),
                                      transcendentals=int(transcendentals),
                                      bytes_accessed=int(bytes_accessed)),
    )(x_pad, *weights, bias_pack)

    return out_padded[:B, :num_classes]


# --------------------- pure-JAX references -----------------------------------

def _reference_forward(x, blocks_params, head_w, head_b):
    """Exact fp32 reference: unfolded eval-mode BN, no padding."""
    def bn(h, g, be, m, v):
        return g * (h - m) * jax.lax.rsqrt(v + BN_EPS) + be

    for p in blocks_params:
        if "wp" in p:
            identity = bn(x @ p["wp"] + p["bp"], p["gp"], p["bep"], p["mp"], p["vp"])
        else:
            identity = x
        h = _gelu_exact(bn(x @ p["w1"] + p["b1"], p["g1"], p["be1"], p["m1"], p["v1"]))
        h = _gelu_exact(bn(h @ p["w2"] + p["b2"], p["g2"], p["be2"], p["m2"], p["v2"]))
        x = _gelu_exact(h + identity)
    return x @ head_w + head_b


def _reference_forward_prepared(x, weights, bias_pack, meta):
    """Precision-matched reference: same folded bf16 weights / f32 accumulation."""
    in_dim, in_pad, num_classes, nc_pad, has_proj, out_pads = meta
    h = _pad2(x.astype(jnp.float32), x.shape[0], in_pad)
    wi = bi = 0
    for hp, dpad in zip(has_proj, out_pads):
        xb = h.astype(jnp.bfloat16)
        w1, w2 = weights[wi], weights[wi + 1]
        b1 = bias_pack[bi:bi + 1, :dpad]
        b2 = bias_pack[bi + 1:bi + 2, :dpad]
        wi += 2
        bi += 2
        if hp:
            wp = weights[wi]
            bp = bias_pack[bi:bi + 1, :dpad]
            wi += 1
            bi += 1
            identity = jnp.dot(xb, wp, preferred_element_type=jnp.float32) + bp
        else:
            identity = h
        t = _gelu_exact(jnp.dot(xb, w1, preferred_element_type=jnp.float32) + b1)
        t = _gelu_exact(jnp.dot(t.astype(jnp.bfloat16), w2,
                                preferred_element_type=jnp.float32) + b2)
        h = _gelu_exact(t + identity)
    wh = weights[wi]
    bh = bias_pack[bi:bi + 1, :nc_pad]
    logits = jnp.dot(h.astype(jnp.bfloat16), wh, preferred_element_type=jnp.float32) + bh
    return logits[:, :num_classes]


# ----------------------- deterministic parameter init -----------------------

def _init_linear(key, in_dim, out_dim):
    kw, kb = jax.random.split(key)
    w = jax.random.normal(kw, (in_dim, out_dim), jnp.float32) * (1.0 / jnp.sqrt(in_dim))
    b = jax.random.normal(kb, (1, out_dim), jnp.float32) * 0.01
    return w, b


def _init_bn(key, dim):
    k1, k2, k3, k4 = jax.random.split(key, 4)
    gamma = 1.0 + 0.1 * jax.random.normal(k1, (1, dim), jnp.float32)
    beta = 0.1 * jax.random.normal(k2, (1, dim), jnp.float32)
    mean = 0.1 * jax.random.normal(k3, (1, dim), jnp.float32)
    var = 1.0 + 0.1 * jax.random.uniform(k4, (1, dim), jnp.float32)
    return gamma, beta, mean, var


def init_resnet_params(key, in_dim, layer_dims, num_classes):
    dims = [in_dim] + list(layer_dims)
    blocks = []
    for i in range(len(dims) - 1):
        din, dout = dims[i], dims[i + 1]
        key, k1, k2, k3, k4, k5, k6 = jax.random.split(key, 7)
        w1, b1 = _init_linear(k1, din, dout)
        g1, be1, m1, v1 = _init_bn(k2, dout)
        w2, b2 = _init_linear(k3, dout, dout)
        g2, be2, m2, v2 = _init_bn(k4, dout)
        p = dict(w1=w1, b1=b1, g1=g1, be1=be1, m1=m1, v1=v1,
                 w2=w2, b2=b2, g2=g2, be2=be2, m2=m2, v2=v2)
        if din != dout:
            wp, bp = _init_linear(k5, din, dout)
            gp, bep, mp, vp = _init_bn(k6, dout)
            p.update(wp=wp, bp=bp, gp=gp, bep=bep, mp=mp, vp=vp)
        blocks.append(p)
    key, kh = jax.random.split(key)
    head_w, head_b = _init_linear(kh, dims[-1], num_classes)
    return blocks, head_w, head_b


# ---------------------------------- main ------------------------------------

if __name__ == "__main__":
    key = jax.random.PRNGKey(0)
    k_params, k_x, k_x2 = jax.random.split(key, 3)

    batch = 8
    in_dim = 32
    layer_dims = [64, 64]   # block_0 has a projection (32->64), block_1 does not
    num_classes = 8

    blocks_params, head_w, head_b = init_resnet_params(k_params, in_dim, layer_dims, num_classes)

    # One-time prep (NOT in the per-call path): fold BN, pad, bf16-cast, pack biases.
    weights, bias_pack, meta = prepare_resnet_params(blocks_params, head_w, head_b)
    weights = jax.block_until_ready(weights)
    bias_pack = jax.block_until_ready(bias_pack)

    fwd = jax.jit(functools.partial(resnet_forward, meta=meta))

    # --- small batch ---------------------------------------------------------
    x = jax.random.normal(k_x, (batch, in_dim), jnp.float32)
    out = jax.block_until_ready(fwd(x, weights, bias_pack))
    assert out.shape == (batch, num_classes), out.shape
    assert bool(jnp.all(jnp.isfinite(out)))

    # precision-matched reference (same folded bf16 weights)
    ref_bf16 = _reference_forward_prepared(x, weights, bias_pack, meta)
    assert bool(jnp.allclose(out, ref_bf16, rtol=5e-3, atol=5e-3)), \
        float(jnp.max(jnp.abs(out - ref_bf16)))

    # loose check vs exact fp32 / unfolded-BN reference (bf16 weights trade precision)
    ref_f32 = _reference_forward(x, blocks_params, head_w, head_b)
    assert bool(jnp.allclose(out, ref_f32, rtol=1e-1, atol=1e-1)), \
        float(jnp.max(jnp.abs(out - ref_f32)))

    # --- larger, non-multiple batch: exercises the batch grid + padding ------
    x2 = jax.random.normal(k_x2, (300, in_dim), jnp.float32)
    out2 = jax.block_until_ready(fwd(x2, weights, bias_pack))
    assert out2.shape == (300, num_classes), out2.shape
    ref2 = _reference_forward_prepared(x2, weights, bias_pack, meta)
    assert bool(jnp.allclose(out2, ref2, rtol=5e-3, atol=5e-3)), \
        float(jnp.max(jnp.abs(out2 - ref2)))

    print("KERNEL_OK")
</pallas_src>

<mosaic_0001>
module attributes {stable_mosaic.version = 11 : i64} {
  func.func @_resnet_fused_kernel(%arg0: i32, %arg1: memref<8x128xf32, #tpu.memory_space<vmem>>, %arg2: memref<128x128xbf16, #tpu.memory_space<vmem>>, %arg3: memref<128x128xbf16, #tpu.memory_space<vmem>>, %arg4: memref<128x128xbf16, #tpu.memory_space<vmem>>, %arg5: memref<128x128xbf16, #tpu.memory_space<vmem>>, %arg6: memref<128x128xbf16, #tpu.memory_space<vmem>>, %arg7: memref<128x128xbf16, #tpu.memory_space<vmem>>, %arg8: memref<8x128xf32, #tpu.memory_space<vmem>>, %arg9: memref<8x128xf32, #tpu.memory_space<vmem>>) attributes {dimension_semantics = [#tpu.dimension_semantics<parallel>], iteration_bounds = array<i64: 1>, scalar_prefetch = 0 : i64, scratch_operands = 0 : i64, tpu.core_type = #tpu.core_type<tc>, window_params = [{transform_indices = @transform_0, window_bounds = array<i64: 8, 128>}, {pipeline_mode = #tpu.pipeline_mode<synchronous>, transform_indices = @transform_1, window_bounds = array<i64: 128, 128>}, {pipeline_mode = #tpu.pipeline_mode<synchronous>, transform_indices = @transform_2, window_bounds = array<i64: 128, 128>}, {pipeline_mode = #tpu.pipeline_mode<synchronous>, transform_indices = @transform_3, window_bounds = array<i64: 128, 128>}, {pipeline_mode = #tpu.pipeline_mode<synchronous>, transform_indices = @transform_4, window_bounds = array<i64: 128, 128>}, {pipeline_mode = #tpu.pipeline_mode<synchronous>, transform_indices = @transform_5, window_bounds = array<i64: 128, 128>}, {pipeline_mode = #tpu.pipeline_mode<synchronous>, transform_indices = @transform_6, window_bounds = array<i64: 128, 128>}, {pipeline_mode = #tpu.pipeline_mode<synchronous>, transform_indices = @transform_7, window_bounds = array<i64: 8, 128>}, {transform_indices = @transform_8, window_bounds = array<i64: 8, 128>}]} {
    %c0 = arith.constant 0 : index
    %c0_0 = arith.constant 0 : index
    %0 = vector.load %arg8[%c0, %c0_0] : memref<8x128xf32, #tpu.memory_space<vmem>>, vector<8x128xf32>
    %c0_1 = arith.constant 0 : index
    %c0_2 = arith.constant 0 : index
    %1 = vector.load %arg1[%c0_1, %c0_2] : memref<8x128xf32, #tpu.memory_space<vmem>>, vector<8x128xf32>
    %2 = arith.truncf %1 : vector<8x128xf32> to vector<8x128xbf16>
    %c0_3 = arith.constant 0 : index
    %c0_4 = arith.constant 0 : index
    %3 = vector.load %arg2[%c0_3, %c0_4] : memref<128x128xbf16, #tpu.memory_space<vmem>>, vector<128x128xbf16>
    %c0_5 = arith.constant 0 : index
    %c0_6 = arith.constant 0 : index
    %4 = vector.load %arg3[%c0_5, %c0_6] : memref<128x128xbf16, #tpu.memory_space<vmem>>, vector<128x128xbf16>
    %5 = vector.extract_strided_slice %0 {offsets = [0, 0], sizes = [1, 128], strides = [1, 1]} : vector<8x128xf32> to vector<1x128xf32>
    %6 = vector.extract_strided_slice %0 {offsets = [1, 0], sizes = [1, 128], strides = [1, 1]} : vector<8x128xf32> to vector<1x128xf32>
    %c0_7 = arith.constant 0 : index
    %c0_8 = arith.constant 0 : index
    %7 = vector.load %arg4[%c0_7, %c0_8] : memref<128x128xbf16, #tpu.memory_space<vmem>>, vector<128x128xbf16>
    %8 = vector.extract_strided_slice %0 {offsets = [2, 0], sizes = [1, 128], strides = [1, 1]} : vector<8x128xf32> to vector<1x128xf32>
    %cst = arith.constant dense<0.000000e+00> : vector<8x128xf32>
    %9 = tpu.matmul %2, %7, %cst {dimension_numbers = #tpu.dot_dimension_numbers<[1], [0], [0], [1], [0, 0, 1, 1], [], []>} : vector<8x128xbf16>, vector<128x128xbf16>, vector<8x128xf32> -> vector<8x128xf32>
    %10 = vector.broadcast %8 : vector<1x128xf32> to vector<8x128xf32>
    %11 = arith.addf %9, %10 : vector<8x128xf32>
    %cst_9 = arith.constant dense<0.000000e+00> : vector<8x128xf32>
    %12 = tpu.matmul %2, %3, %cst_9 {dimension_numbers = #tpu.dot_dimension_numbers<[1], [0], [0], [1], [0, 0, 1, 1], [], []>} : vector<8x128xbf16>, vector<128x128xbf16>, vector<8x128xf32> -> vector<8x128xf32>
    %13 = vector.broadcast %5 : vector<1x128xf32> to vector<8x128xf32>
    %14 = arith.addf %12, %13 : vector<8x128xf32>
    %cst_10 = arith.constant 5.000000e-01 : f32
    %15 = vector.broadcast %cst_10 : f32 to vector<8x128xf32>
    %16 = arith.mulf %15, %14 : vector<8x128xf32>
    %cst_11 = arith.constant 0.707106769 : f32
    %17 = vector.broadcast %cst_11 : f32 to vector<8x128xf32>
    %18 = arith.mulf %14, %17 : vector<8x128xf32>
    %19 = math.erf %18 : vector<8x128xf32>
    %cst_12 = arith.constant 1.000000e+00 : f32
    %20 = vector.broadcast %cst_12 : f32 to vector<8x128xf32>
    %21 = arith.addf %20, %19 : vector<8x128xf32>
    %22 = arith.mulf %16, %21 : vector<8x128xf32>
    %23 = arith.truncf %22 : vector<8x128xf32> to vector<8x128xbf16>
    %cst_13 = arith.constant dense<0.000000e+00> : vector<8x128xf32>
    %24 = tpu.matmul %23, %4, %cst_13 {dimension_numbers = #tpu.dot_dimension_numbers<[1], [0], [0], [1], [0, 0, 1, 1], [], []>} : vector<8x128xbf16>, vector<128x128xbf16>, vector<8x128xf32> -> vector<8x128xf32>
    %25 = vector.broadcast %6 : vector<1x128xf32> to vector<8x128xf32>
    %26 = arith.addf %24, %25 : vector<8x128xf32>
    %cst_14 = arith.constant 5.000000e-01 : f32
    %27 = vector.broadcast %cst_14 : f32 to vector<8x128xf32>
    %28 = arith.mulf %27, %26 : vector<8x128xf32>
    %cst_15 = arith.constant 0.707106769 : f32
    %29 = vector.broadcast %cst_15 : f32 to vector<8x128xf32>
    %30 = arith.mulf %26, %29 : vector<8x128xf32>
    %31 = math.erf %30 : vector<8x128xf32>
    %cst_16 = arith.constant 1.000000e+00 : f32
    %32 = vector.broadcast %cst_16 : f32 to vector<8x128xf32>
    %33 = arith.addf %32, %31 : vector<8x128xf32>
    %34 = arith.mulf %28, %33 : vector<8x128xf32>
    %35 = arith.addf %34, %11 : vector<8x128xf32>
    %cst_17 = arith.constant 5.000000e-01 : f32
    %36 = vector.broadcast %cst_17 : f32 to vector<8x128xf32>
    %37 = arith.mulf %36, %35 : vector<8x128xf32>
    %cst_18 = arith.constant 0.707106769 : f32
    %38 = vector.broadcast %cst_18 : f32 to vector<8x128xf32>
    %39 = arith.mulf %35, %38 : vector<8x128xf32>
    %40 = math.erf %39 : vector<8x128xf32>
    %cst_19 = arith.constant 1.000000e+00 : f32
    %41 = vector.broadcast %cst_19 : f32 to vector<8x128xf32>
    %42 = arith.addf %41, %40 : vector<8x128xf32>
    %43 = arith.mulf %37, %42 : vector<8x128xf32>
    %44 = arith.truncf %43 : vector<8x128xf32> to vector<8x128xbf16>
    %c0_20 = arith.constant 0 : index
    %c0_21 = arith.constant 0 : index
    %45 = vector.load %arg5[%c0_20, %c0_21] : memref<128x128xbf16, #tpu.memory_space<vmem>>, vector<128x128xbf16>
    %c0_22 = arith.constant 0 : index
    %c0_23 = arith.constant 0 : index
    %46 = vector.load %arg6[%c0_22, %c0_23] : memref<128x128xbf16, #tpu.memory_space<vmem>>, vector<128x128xbf16>
    %47 = vector.extract_strided_slice %0 {offsets = [3, 0], sizes = [1, 128], strides = [1, 1]} : vector<8x128xf32> to vector<1x128xf32>
    %48 = vector.extract_strided_slice %0 {offsets = [4, 0], sizes = [1, 128], strides = [1, 1]} : vector<8x128xf32> to vector<1x128xf32>
    %cst_24 = arith.constant dense<0.000000e+00> : vector<8x128xf32>
    %49 = tpu.matmul %44, %45, %cst_24 {dimension_numbers = #tpu.dot_dimension_numbers<[1], [0], [0], [1], [0, 0, 1, 1], [], []>} : vector<8x128xbf16>, vector<128x128xbf16>, vector<8x128xf32> -> vector<8x128xf32>
    %50 = vector.broadcast %47 : vector<1x128xf32> to vector<8x128xf32>
    %51 = arith.addf %49, %50 : vector<8x128xf32>
    %cst_25 = arith.constant 5.000000e-01 : f32
    %52 = vector.broadcast %cst_25 : f32 to vector<8x128xf32>
    %53 = arith.mulf %52, %51 : vector<8x128xf32>
    %cst_26 = arith.constant 0.707106769 : f32
    %54 = vector.broadcast %cst_26 : f32 to vector<8x128xf32>
    %55 = arith.mulf %51, %54 : vector<8x128xf32>
    %56 = math.erf %55 : vector<8x128xf32>
    %cst_27 = arith.constant 1.000000e+00 : f32
    %57 = vector.broadcast %cst_27 : f32 to vector<8x128xf32>
    %58 = arith.addf %57, %56 : vector<8x128xf32>
    %59 = arith.mulf %53, %58 : vector<8x128xf32>
    %60 = arith.truncf %59 : vector<8x128xf32> to vector<8x128xbf16>
    %cst_28 = arith.constant dense<0.000000e+00> : vector<8x128xf32>
    %61 = tpu.matmul %60, %46, %cst_28 {dimension_numbers = #tpu.dot_dimension_numbers<[1], [0], [0], [1], [0, 0, 1, 1], [], []>} : vector<8x128xbf16>, vector<128x128xbf16>, vector<8x128xf32> -> vector<8x128xf32>
    %62 = vector.broadcast %48 : vector<1x128xf32> to vector<8x128xf32>
    %63 = arith.addf %61, %62 : vector<8x128xf32>
    %cst_29 = arith.constant 5.000000e-01 : f32
    %64 = vector.broadcast %cst_29 : f32 to vector<8x128xf32>
    %65 = arith.mulf %64, %63 : vector<8x128xf32>
    %cst_30 = arith.constant 0.707106769 : f32
    %66 = vector.broadcast %cst_30 : f32 to vector<8x128xf32>
    %67 = arith.mulf %63, %66 : vector<8x128xf32>
    %68 = math.erf %67 : vector<8x128xf32>
    %cst_31 = arith.constant 1.000000e+00 : f32
    %69 = vector.broadcast %cst_31 : f32 to vector<8x128xf32>
    %70 = arith.addf %69, %68 : vector<8x128xf32>
    %71 = arith.mulf %65, %70 : vector<8x128xf32>
    %72 = arith.addf %71, %43 : vector<8x128xf32>
    %cst_32 = arith.constant 5.000000e-01 : f32
    %73 = vector.broadcast %cst_32 : f32 to vector<8x128xf32>
    %74 = arith.mulf %73, %72 : vector<8x128xf32>
    %cst_33 = arith.constant 0.707106769 : f32
    %75 = vector.broadcast %cst_33 : f32 to vector<8x128xf32>
    %76 = arith.mulf %72, %75 : vector<8x128xf32>
    %77 = math.erf %76 : vector<8x128xf32>
    %cst_34 = arith.constant 1.000000e+00 : f32
    %78 = vector.broadcast %cst_34 : f32 to vector<8x128xf32>
    %79 = arith.addf %78, %77 : vector<8x128xf32>
    %80 = arith.mulf %74, %79 : vector<8x128xf32>
    %c0_35 = arith.constant 0 : index
    %c0_36 = arith.constant 0 : index
    %81 = vector.load %arg7[%c0_35, %c0_36] : memref<128x128xbf16, #tpu.memory_space<vmem>>, vector<128x128xbf16>
    %82 = vector.extract_strided_slice %0 {offsets = [5, 0], sizes = [1, 128], strides = [1, 1]} : vector<8x128xf32> to vector<1x128xf32>
    %83 = arith.truncf %80 : vector<8x128xf32> to vector<8x128xbf16>
    %cst_37 = arith.constant dense<0.000000e+00> : vector<8x128xf32>
    %84 = tpu.matmul %83, %81, %cst_37 {dimension_numbers = #tpu.dot_dimension_numbers<[1], [0], [0], [1], [0, 0, 1, 1], [], []>} : vector<8x128xbf16>, vector<128x128xbf16>, vector<8x128xf32> -> vector<8x128xf32>
    %85 = vector.broadcast %82 : vector<1x128xf32> to vector<8x128xf32>
    %86 = arith.addf %84, %85 : vector<8x128xf32>
    %c0_38 = arith.constant 0 : index
    %c0_39 = arith.constant 0 : index
    %87 = vector.load %arg9[%c0_38, %c0_39] : memref<8x128xf32, #tpu.memory_space<vmem>>, vector<8x128xf32>
    tpu.vector_store %arg9[%c0_38, %c0_39], %86 {strides = array<i32>} : memref<8x128xf32, #tpu.memory_space<vmem>>, vector<8x128xf32>,
    return
  }
  func.func @transform_0(%arg0: i32) -> (i32, i32) {
    %c0_i32 = arith.constant 0 : i32
    %c0_i32_0 = arith.constant 0 : i32
    return %arg0, %c0_i32 : i32, i32
  }
  func.func @transform_1(%arg0: i32) -> (i32, i32) {
    %c0_i32 = arith.constant 0 : i32
    %c0_i32_0 = arith.constant 0 : i32
    %c0_i32_1 = arith.constant 0 : i32
    return %c0_i32, %c0_i32_0 : i32, i32
  }
  func.func @transform_2(%arg0: i32) -> (i32, i32) {
    %c0_i32 = arith.constant 0 : i32
    %c0_i32_0 = arith.constant 0 : i32
    %c0_i32_1 = arith.constant 0 : i32
    return %c0_i32, %c0_i32_0 : i32, i32
  }
  func.func @transform_3(%arg0: i32) -> (i32, i32) {
    %c0_i32 = arith.constant 0 : i32
    %c0_i32_0 = arith.constant 0 : i32
    %c0_i32_1 = arith.constant 0 : i32
    return %c0_i32, %c0_i32_0 : i32, i32
  }
  func.func @transform_4(%arg0: i32) -> (i32, i32) {
    %c0_i32 = arith.constant 0 : i32
    %c0_i32_0 = arith.constant 0 : i32
    %c0_i32_1 = arith.constant 0 : i32
    return %c0_i32, %c0_i32_0 : i32, i32
  }
  func.func @transform_5(%arg0: i32) -> (i32, i32) {
    %c0_i32 = arith.constant 0 : i32
    %c0_i32_0 = arith.constant 0 : i32
    %c0_i32_1 = arith.constant 0 : i32
    return %c0_i32, %c0_i32_0 : i32, i32
  }
  func.func @transform_6(%arg0: i32) -> (i32, i32) {
    %c0_i32 = arith.constant 0 : i32
    %c0_i32_0 = arith.constant 0 : i32
    %c0_i32_1 = arith.constant 0 : i32
    return %c0_i32, %c0_i32_0 : i32, i32
  }
  func.func @transform_7(%arg0: i32) -> (i32, i32) {
    %c0_i32 = arith.constant 0 : i32
    %c0_i32_0 = arith.constant 0 : i32
    %c0_i32_1 = arith.constant 0 : i32
    return %c0_i32, %c0_i32_0 : i32, i32
  }
  func.func @transform_8(%arg0: i32) -> (i32, i32) {
    %c0_i32 = arith.constant 0 : i32
    %c0_i32_0 = arith.constant 0 : i32
    return %arg0, %c0_i32 : i32, i32
  }
}

</mosaic_0001>

<bundles_post_ra>
// kernel: resnet_forward.1
= control target key start
LH: loop header
LB: loop body
LE: loop exit
PB: predicated region body
PF: predicated region fallthrough
CT: control target
= control target key end

     0   :  { %13 = vsyncpa [#allocation3], 0  ;;  %s1542_s0 = inlined_call_operand.vmem [shape: f32[8,128], index: 0, kind: input, shape index: {}]   ;;  %s1543_s1 = inlined_call_operand.hbm [shape: bf16[128,128], index: 1, kind: input, shape index: {}]   ;;  %s1544_s2 = inlined_call_operand.hbm [shape: bf16[128,128], index: 2, kind: input, shape index: {}]   ;;  %s1545_s3 = inlined_call_operand.hbm [shape: bf16[128,128], index: 3, kind: input, shape index: {}]   ;;  %s1546_s4 = inlined_call_operand.hbm [shape: bf16[128,128], index: 4, kind: input, shape index: {}]   ;;  %s1547_s5 = inlined_call_operand.hbm [shape: bf16[128,128], index: 5, kind: input, shape index: {}]   ;;  %s1548_s6 = inlined_call_operand.hbm [shape: bf16[128,128], index: 6, kind: input, shape index: {}]   ;;  %s1549_s7 = inlined_call_operand.vmem [shape: f32[8,128], index: 7, kind: input, shape index: {}]   ;;  %s1550_s8 = inlined_call_operand.hbm [shape: f32[8,128], index: 8, kind: output, shape index: {}]  }
   0x1   :  { %14 = vsyncpa [#allocation6], 0 }
   0x2   :  { %15 = vsyncpa [#allocation9], 0 }
   0x3   :  { %16 = vsyncpa [#allocation12], 0 }
   0x4   :  { %17 = vsyncpa [#allocation4], 0  ;;  %s1276_s27 = smov [#allocation5]   ;;  %s1277_s29 = smov [#allocation8]  }
   0x5   :  { %s37_s28 = sshll.u32 %s1276_s27, 4  ;;  %s61_s30 = sshll.u32 %s1277_s29, 4  ;;  %s38_s28 = int_to_ptr.vmem [resolvable:$true] %s37_s28  ;;  %s1332_s30 = int_to_ptr.vmem [resolvable:$true] %s61_s30 }
   0x6   :  { %s1112_s11 = scalar_lea.hbm %s1544_s2, 1024 }
   0x7   :  { %p1113_p0 = scmp.ne.s32.totalorder %s1544_s2, %s1112_s11  ;;  %p1116_p1 = scmp.lt.u32.totalorder %s1112_s11, %s1544_s2 }
   0x9   :  { %p1118_p2 = pnand %p1116_p1, %p1113_p0 }
   0xb   :  { %1121 = shalt.err (!%p1118_p2)
}
   0xc   :  { %s1122_s16 = scalar_lea.vmem %s38_s28, 1024  ;;  %p1127_p4 = scmp.lt.s32.totalorder %s38_s28, %s38_s28 }
   0xd   :  { %p1123_p3 = scmp.ne.s32.totalorder %s38_s28, %s1122_s16  ;;  %p1128_p5 = scmp.lt.s32.totalorder %s1122_s16, %s1122_s16 }
   0xf   :  { %p1129_p6 = por %p1128_p5, %p1127_p4 }
  0x11   :  { %p1130_p7 = pnand %p1129_p6, %p1123_p3 }
  0x13   :  { %1133 = shalt.err (!%p1130_p7)
}
  0x14   :  { %s1278_s17 = smov 64   ;;  %s1279_s18 = smov 4  }
  0x15   :  { %43 = dma.hbm_to_vmem [thread:$0]  %s1544_s2, 1024, %s38_s28, [#allocation6], %s1278_s17, %s1278_s17, %s1279_s18  }
  0x16   :  { %s1134_s23 = scalar_lea.hbm %s1546_s4, 1024 }
  0x17   :  { %p1135_p8 = scmp.ne.s32.totalorder %s1546_s4, %s1134_s23  ;;  %p1138_p9 = scmp.lt.u32.totalorder %s1134_s23, %s1546_s4 }
  0x19   :  { %p1140_p10 = pnand %p1138_p9, %p1135_p8 }
  0x1b   :  { %1143 = shalt.err (!%p1140_p10)
}
  0x1c   :  { %s1144_s29 = scalar_lea.vmem %s1332_s30, 1024  ;;  %p1149_p12 = scmp.lt.s32.totalorder %s1332_s30, %s1332_s30 }
  0x1d   :  { %p1145_p11 = scmp.ne.s32.totalorder %s1332_s30, %s1144_s29  ;;  %p1150_p13 = scmp.lt.s32.totalorder %s1144_s29, %s1144_s29 }
  0x1f   :  { %p1151_p0 = por %p1150_p13, %p1149_p12 }
  0x21   :  { %p1152_p1 = pnand %p1151_p0, %p1145_p11 }
  0x23   :  { %1155 = shalt.err (!%p1152_p1)
}
  0x24   :  { %67 = dma.hbm_to_vmem [thread:$0]  %s1546_s4, 1024, %s1332_s30, [#allocation9], %s1278_s17, %s1278_s17, %s1279_s18  }
  0x25   :  { %s1280_s9 = smov [#allocation2]   ;;  %s1281_s11 = smov [#allocation7]  }
  0x26   :  { %s25_s10 = sshll.u32 %s1280_s9, 4  ;;  %s49_s12 = sshll.u32 %s1281_s11, 4  ;;  %s26_s10 = int_to_ptr.vmem [resolvable:$true] %s25_s10  ;;  %s1369_s12 = int_to_ptr.vmem [resolvable:$true] %s49_s12 }
  0x27   :  { %s1156_s15 = scalar_lea.hbm %s1543_s1, 1024 }
  0x28   :  { %p1157_p2 = scmp.ne.s32.totalorder %s1543_s1, %s1156_s15  ;;  %p1160_p3 = scmp.lt.u32.totalorder %s1156_s15, %s1543_s1 }
  0x2a   :  { %p1162_p4 = pnand %p1160_p3, %p1157_p2 }
  0x2c   :  { %1165 = shalt.err (!%p1162_p4)
}
  0x2d   :  { %s1166_s4 = scalar_lea.vmem %s26_s10, 1024  ;;  %p1171_p6 = scmp.lt.s32.totalorder %s26_s10, %s26_s10 }
  0x2e   :  { %p1167_p5 = scmp.ne.s32.totalorder %s26_s10, %s1166_s4  ;;  %p1172_p7 = scmp.lt.s32.totalorder %s1166_s4, %s1166_s4 }
  0x30   :  { %p1173_p8 = por %p1172_p7, %p1171_p6 }
  0x32   :  { %p1174_p9 = pnand %p1173_p8, %p1167_p5 }
  0x34   :  { %1177 = shalt.err (!%p1174_p9)
}
  0x35   :  { %31 = dma.hbm_to_vmem [thread:$0]  %s1543_s1, 1024, %s26_s10, [#allocation3], %s1278_s17, %s1278_s17, %s1279_s18  }
  0x36   :  { %s1178_s25 = scalar_lea.hbm %s1545_s3, 1024 }
  0x37   :  { %p1179_p10 = scmp.ne.s32.totalorder %s1545_s3, %s1178_s25  ;;  %p1182_p11 = scmp.lt.u32.totalorder %s1178_s25, %s1545_s3 }
  0x39   :  { %p1184_p12 = pnand %p1182_p11, %p1179_p10 }
  0x3b   :  { %1187 = shalt.err (!%p1184_p12)
}
  0x3c   :  { %s1188_s28 = scalar_lea.vmem %s1369_s12, 1024  ;;  %p1193_p0 = scmp.lt.s32.totalorder %s1369_s12, %s1369_s12 }
  0x3d   :  { %p1189_p13 = scmp.ne.s32.totalorder %s1369_s12, %s1188_s28  ;;  %p1194_p1 = scmp.lt.s32.totalorder %s1188_s28, %s1188_s28 }
  0x3f   :  { %p1195_p2 = por %p1194_p1, %p1193_p0 }
  0x41   :  { %p1196_p3 = pnand %p1195_p2, %p1189_p13 }
  0x43   :  { %1199 = shalt.err (!%p1196_p3)
}
  0x44   :  { %55 = dma.hbm_to_vmem [thread:$0]  %s1545_s3, 1024, %s1369_s12, [#allocation6], %s1278_s17, %s1278_s17, %s1279_s18  }
  0x45   :  { %s1282_s10 = smov [#allocation10]   ;;  %s1283_s13 = smov [#allocation11]  }
  0x46   :  { %s73_s11 = sshll.u32 %s1282_s10, 4  ;;  %s85_s14 = sshll.u32 %s1283_s13, 4  ;;  %s74_s11 = int_to_ptr.vmem [resolvable:$true] %s73_s11  ;;  %s1406_s14 = int_to_ptr.vmem [resolvable:$true] %s85_s14 }
  0x47   :  { %s1200_s19 = scalar_lea.hbm %s1547_s5, 1024 }
  0x48   :  { %p1201_p4 = scmp.ne.s32.totalorder %s1547_s5, %s1200_s19  ;;  %p1204_p5 = scmp.lt.u32.totalorder %s1200_s19, %s1547_s5 }
  0x4a   :  { %p1206_p6 = pnand %p1204_p5, %p1201_p4 }
  0x4c   :  { %1209 = shalt.err (!%p1206_p6)
}
  0x4d   :  { %s1210_s3 = scalar_lea.vmem %s74_s11, 1024  ;;  %p1215_p8 = scmp.lt.s32.totalorder %s74_s11, %s74_s11 }
  0x4e   :  { %p1211_p7 = scmp.ne.s32.totalorder %s74_s11, %s1210_s3  ;;  %p1216_p9 = scmp.lt.s32.totalorder %s1210_s3, %s1210_s3 }
  0x50   :  { %p1217_p10 = por %p1216_p9, %p1215_p8 }
  0x52   :  { %p1218_p11 = pnand %p1217_p10, %p1211_p7 }
  0x54   :  { %1221 = shalt.err (!%p1218_p11)
}
  0x55   :  { %79 = dma.hbm_to_vmem [thread:$0]  %s1547_s5, 1024, %s74_s11, [#allocation9], %s1278_s17, %s1278_s17, %s1279_s18  }
  0x56   :  { %s1222_s25 = scalar_lea.hbm %s1548_s6, 1024 }
  0x57   :  { %p1223_p12 = scmp.ne.s32.totalorder %s1548_s6, %s1222_s25  ;;  %p1226_p13 = scmp.lt.u32.totalorder %s1222_s25, %s1548_s6 }
  0x59   :  { %p1228_p0 = pnand %p1226_p13, %p1223_p12 }
  0x5b   :  { %1231 = shalt.err (!%p1228_p0)
}
  0x5c   :  { %s1232_s28 = scalar_lea.vmem %s1406_s14, 1024  ;;  %p1237_p2 = scmp.lt.s32.totalorder %s1406_s14, %s1406_s14 }
  0x5d   :  { %p1233_p1 = scmp.ne.s32.totalorder %s1406_s14, %s1232_s28  ;;  %p1238_p3 = scmp.lt.s32.totalorder %s1232_s28, %s1232_s28 }
  0x5f   :  { %p1239_p4 = por %p1238_p3, %p1237_p2 }
  0x61   :  { %p1240_p5 = pnand %p1239_p4, %p1233_p1 }
  0x63   :  { %1243 = shalt.err (!%p1240_p5)
}
  0x64   :  { %91 = dma.hbm_to_vmem [thread:$0]  %s1548_s6, 1024, %s1406_s14, [#allocation12], %s1278_s17, %s1278_s17, %s1279_s18  }
  0x65   :  { %1266 = dma.done.wait [#allocation3], 1024  }
  0x66   :  { %1267 = vsyncadd [#allocation3], 4294966272 }
  0x67   :  { %1268 = dma.done.wait [#allocation6], 2048  }
  0x68   :  { %1269 = vsyncadd [#allocation6], 4294965248 }
  0x69   :  { %1270 = dma.done.wait [#allocation9], 2048  }
  0x6a   :  { %1271 = vsyncadd [#allocation9], 4294965248 }
  0x6b   :  { %1272 = dma.done.wait [#allocation12], 1024  }
  0x6c   :  { %1273 = vsyncadd [#allocation12], 4294966272  ;;  %v1284_v0 = vmov 0.0   ;;  %vm1285_vm0 = vmmov 0   ;;  %v1052_v1 = vld [vmem:[#allocation2] sm:$0xff]   ;;  %v1053_v2 = vld [vmem:[#allocation2 + $0x8] sm:$0xff]   ;;  %v164_v27 = vlaneseq }
  0x6d   :  { %941 = vmatprep.subr.bf16.mxu1 %v1284_v0  ;;  %957 = vmatprep.mubr.msk.bf16.mxu1 %vm1285_vm0, %v1284_v0  ;;  %v1054_v3 = vld [vmem:[#allocation2 + $0x10] sm:$0xff]   ;;  %v1060_v4 = vld [vmem:[#allocation7] sm:$0xff]   ;;  %v1055_v5 = vld [vmem:[#allocation2 + $0x18] sm:$0xff]  }
  0x6e   :  { %921 = vmatprep.subr.bf16.mxu0 %v1284_v0  ;;  %937 = vmatprep.mubr.msk.bf16.mxu0 %vm1285_vm0, %v1284_v0  ;;  %v1061_v6 = vld [vmem:[#allocation7 + $0x8] sm:$0xff]   ;;  %v1056_v7 = vld [vmem:[#allocation2 + $0x20] sm:$0xff]   ;;  %v1062_v8 = vld [vmem:[#allocation7 + $0x10] sm:$0xff]   ;;  %v1480_v28 = vshrl.u32 %v164_v27, 7 }
  0x6f   :  { %942 = vmatpush3.bf16.msra.mxu1 %v1052_v1  ;;  %922 = vmatpush3.bf16.msra.mxu0 %v1060_v4  ;;  %v1057_v9 = vld [vmem:[#allocation2 + $0x28] sm:$0xff]   ;;  %v1063_v10 = vld [vmem:[#allocation7 + $0x18] sm:$0xff]   ;;  %v1058_v11 = vld [vmem:[#allocation2 + $0x30] sm:$0xff]  }
  0x70   :  { %943 = vmatprep.subr.bf16.mxu1 %v1284_v0  ;;  %923 = vmatprep.subr.bf16.mxu0 %v1284_v0  ;;  %v1064_v12 = vld [vmem:[#allocation7 + $0x20] sm:$0xff]   ;;  %v1059_v13 = vld [vmem:[#allocation2 + $0x38] sm:$0xff]   ;;  %v1065_v15 = vld [vmem:[#allocation7 + $0x28] sm:$0xff]   ;;  %v258_v29 = vsub.s32 0, %v1480_v28  ;;  %v356_v58 = vsub.s32 1, %v1480_v28 }
  0x71   :  { %v114_v14 = vld [vmem:[%s1542_s0] sm:$0xff]  ;;  %v1066_v17 = vld [vmem:[#allocation7 + $0x30] sm:$0xff]   ;;  %v1067_v18 = vld [vmem:[#allocation7 + $0x38] sm:$0xff]  }
  0x72   :  { %v115_v16 = vpack.c.bf16 %v114_v14, %v114_v14  ;;  %v1068_v19 = vld [vmem:[#allocation5] sm:$0xff]   ;;  %v1069_v20 = vld [vmem:[#allocation5 + $0x8] sm:$0xff]   ;;  %v1070_v21 = vld [vmem:[#allocation5 + $0x10] sm:$0xff]  }
  0x73   :  { %944 = vmatpush3.bf16.msra.mxu1 %v1053_v2  ;;  %924 = vmatpush3.bf16.msra.mxu0 %v1061_v6  ;;  %v1071_v22 = vld [vmem:[#allocation5 + $0x18] sm:$0xff]   ;;  %v1072_v23 = vld [vmem:[#allocation5 + $0x20] sm:$0xff]   ;;  %v1073_v24 = vld [vmem:[#allocation5 + $0x28] sm:$0xff]  }
  0x74   :  { %945 = vmatprep.subr.bf16.mxu1 %v1284_v0  ;;  %925 = vmatprep.subr.bf16.mxu0 %v1284_v0  ;;  %v1074_v25 = vld [vmem:[#allocation5 + $0x30] sm:$0xff]   ;;  %v1075_v26 = vld [vmem:[#allocation5 + $0x38] sm:$0xff]   ;;  %v1486_v30 = vld [vmem:[%s1549_s7] sm:$0xff]  ;;  %s1286_s7 = smov [#allocation13]  }
  0x75   :  { %v259_v31 = vrot.slane %v1486_v30, %v258_v29  ;;  %v1076_v47 = vld [vmem:[#allocation8] sm:$0xff]   ;;  %v1077_v48 = vld [vmem:[#allocation8 + $0x8] sm:$0xff]   ;;  %v1078_v49 = vld [vmem:[#allocation8 + $0x10] sm:$0xff]   ;;  %v357_v59 = vrot.slane %v1486_v30, %v356_v58  ;;  %s807_s9 = sshll.u32 %s1286_s7, 4  ;;  %s808_s9 = int_to_ptr.vmem [resolvable:$true] %s807_s9 }
  0x76   :  { %v1079_v50 = vld [vmem:[#allocation8 + $0x18] sm:$0xff]   ;;  %v1080_v51 = vld [vmem:[#allocation8 + $0x20] sm:$0xff]   ;;  %v1081_v52 = vld [vmem:[#allocation8 + $0x28] sm:$0xff]   ;;  %s1244_s10 = scalar_lea.vmem %s808_s9, 128  ;;  %p1249_p7 = scmp.lt.s32.totalorder %s808_s9, %s808_s9 }
  0x77   :  { %946 = vmatpush3.bf16.msra.mxu1 %v1054_v3  ;;  %926 = vmatpush3.bf16.msra.mxu0 %v1062_v8  ;;  %v1082_v53 = vld [vmem:[#allocation8 + $0x30] sm:$0xff]   ;;  %v1083_v54 = vld [vmem:[#allocation8 + $0x38] sm:$0xff]   ;;  %v1084_v55 = vld [vmem:[#allocation10] sm:$0xff]   ;;  %v166_v3 = vsub.s32 2, %v1480_v28  ;;  %p1245_p6 = scmp.ne.s32.totalorder %s808_s9, %s1244_s10  ;;  %p1250_p8 = scmp.lt.s32.totalorder %s1244_s10, %s1244_s10 }
  0x78   :  { %947 = vmatprep.subr.bf16.mxu1 %v1284_v0  ;;  %927 = vmatprep.subr.bf16.mxu0 %v1284_v0  ;;  %v1085_v56 = vld [vmem:[#allocation10 + $0x8] sm:$0xff]   ;;  %v1086_v57 = vld [vmem:[#allocation10 + $0x10] sm:$0xff]  }
  0x79   :  { %v167_v4 = vrot.slane %v1486_v30, %v166_v3  ;;  %p1251_p9 = por %p1250_p8, %p1249_p7 }
  0x7b   :  { %948 = vmatpush3.bf16.msra.mxu1 %v1055_v5  ;;  %928 = vmatpush3.bf16.msra.mxu0 %v1063_v10  ;;  %p1252_p10 = pnand %p1251_p9, %p1245_p6 }
  0x7c   :  { %949 = vmatprep.subr.bf16.mxu1 %v1284_v0  ;;  %929 = vmatprep.subr.bf16.mxu0 %v1284_v0 }
  0x7f   :  { %950 = vmatpush3.bf16.msra.mxu1 %v1056_v7  ;;  %930 = vmatpush3.bf16.msra.mxu0 %v1064_v12 }
  0x80   :  { %951 = vmatprep.subr.bf16.mxu1 %v1284_v0  ;;  %931 = vmatprep.subr.bf16.mxu0 %v1284_v0 }
  0x83   :  { %952 = vmatpush3.bf16.msra.mxu1 %v1057_v9  ;;  %932 = vmatpush3.bf16.msra.mxu0 %v1065_v15 }
  0x84   :  { %953 = vmatprep.subr.bf16.mxu1 %v1284_v0  ;;  %933 = vmatprep.subr.bf16.mxu0 %v1284_v0 }
  0x87   :  { %954 = vmatpush3.bf16.msra.mxu1 %v1058_v11  ;;  %934 = vmatpush3.bf16.msra.mxu0 %v1066_v17  ;;  %v1087_v17 = vld [vmem:[#allocation10 + $0x18] sm:$0xff]  }
  0x88   :  { %955 = vmatprep.subr.bf16.mxu1 %v1284_v0  ;;  %935 = vmatprep.subr.bf16.mxu0 %v1284_v0 }
  0x8b   :  { %956 = vmatpush3.bf16.msra.mxu1 %v1059_v13  ;;  %936 = vmatpush3.bf16.msra.mxu0 %v1067_v18  ;;  %v1088_v18 = vld [vmem:[#allocation10 + $0x20] sm:$0xff]  }
  0x8c   :  { %981 = vmatprep.subr.bf16.mxu1 %v1284_v0  ;;  %961 = vmatprep.subr.bf16.mxu0 %v1284_v0 }
  0x8e   :  { %958 = vmatmul.mubr.bf16.vlgmr.msra.gmra.mrb[0].mxu1 %v115_v16  ;;  %938 = vmatmul.mubr.bf16.vlgmr.msra.gmra.mrb[0].mxu0 %v115_v16 }
  0x8f   :  { %997 = vmatprep.mubr.msk.bf16.mxu1 %vm1285_vm0, %v1284_v0  ;;  %962 = vmatpush3.bf16.msra.mxu0 %v1068_v19  ;;  %v1089_v19 = vld [vmem:[#allocation10 + $0x28] sm:$0xff]  }
  0x90   :  { %977 = vmatprep.mubr.msk.bf16.mxu0 %vm1285_vm0, %v1284_v0  ;;  %963 = vmatprep.subr.bf16.mxu0 %v1284_v0 }
  0x91   :  { %982 = vmatpush3.bf16.msra.mxu1 %v1076_v47 }
  0x92   :  { %983 = vmatprep.subr.bf16.mxu1 %v1284_v0 }
  0x93   :  { %964 = vmatpush3.bf16.msra.mxu0 %v1069_v20  ;;  %v1090_v20 = vld [vmem:[#allocation10 + $0x30] sm:$0xff]  }
  0x94   :  { %965 = vmatprep.subr.bf16.mxu0 %v1284_v0 }
  0x95   :  { %984 = vmatpush3.bf16.msra.mxu1 %v1077_v48 }
  0x96   :  { %985 = vmatprep.subr.bf16.mxu1 %v1284_v0 }
  0x97   :  { %966 = vmatpush3.bf16.msra.mxu0 %v1070_v21  ;;  %v1091_v21 = vld [vmem:[#allocation10 + $0x38] sm:$0xff]  }
  0x98   :  { %967 = vmatprep.subr.bf16.mxu0 %v1284_v0 }
  0x99   :  { %986 = vmatpush3.bf16.msra.mxu1 %v1078_v49 }
  0x9a   :  { %987 = vmatprep.subr.bf16.mxu1 %v1284_v0 }
  0x9b   :  { %968 = vmatpush3.bf16.msra.mxu0 %v1071_v22  ;;  %v492_v22 = vsub.s32 3, %v1480_v28 }
  0x9c   :  { %969 = vmatprep.subr.bf16.mxu0 %v1284_v0 }
  0x9d   :  { %988 = vmatpush3.bf16.msra.mxu1 %v1079_v50 }
  0x9e   :  { %989 = vmatprep.subr.bf16.mxu1 %v1284_v0 }
  0x9f   :  { %970 = vmatpush3.bf16.msra.mxu0 %v1072_v23  ;;  %v493_v23 = vrot.slane %v1486_v30, %v492_v22 }
  0xa0   :  { %971 = vmatprep.subr.bf16.mxu0 %v1284_v0 }
  0xa1   :  { %990 = vmatpush3.bf16.msra.mxu1 %v1080_v51 }
  0xa2   :  { %991 = vmatprep.subr.bf16.mxu1 %v1284_v0 }
  0xa3   :  { %972 = vmatpush3.bf16.msra.mxu0 %v1073_v24 }
  0xa4   :  { %973 = vmatprep.subr.bf16.mxu0 %v1284_v0 }
  0xa5   :  { %992 = vmatpush3.bf16.msra.mxu1 %v1081_v52 }
  0xa6   :  { %993 = vmatprep.subr.bf16.mxu1 %v1284_v0 }
  0xa7   :  { %974 = vmatpush3.bf16.msra.mxu0 %v1074_v25 }
  0xa8   :  { %975 = vmatprep.subr.bf16.mxu0 %v1284_v0 }
  0xa9   :  { %994 = vmatpush3.bf16.msra.mxu1 %v1082_v53 }
  0xaa   :  { %995 = vmatprep.subr.bf16.mxu1 %v1284_v0 }
  0xab   :  { %976 = vmatpush3.bf16.msra.mxu0 %v1075_v26 }
  0xac   :  { %1001 = vmatprep.subr.bf16.mxu0 %v1284_v0 }
  0xad   :  { %996 = vmatpush3.bf16.msra.mxu1 %v1083_v54 }
  0xae   :  { %1021 = vmatprep.subr.bf16.mxu1 %v1284_v0 }
 0x161   :  { %v342_v32 = vpop.f32.mrb[0].mxu1  ;;  %v250_v38 = vpop.f32.mrb[0].mxu0 }
 0x162   :  { %v343_v33 = vadd.f32 %v342_v32, %v259_v31  ;;  %v959_v34 = vpop.f32.mrb[1].mxu1  ;;  %v939_v39 = vpop.f32.mrb[1].mxu0  ;;  %v251_v8 = vadd.f32 %v250_v38, %v167_v4  ;;  %v1093_v38 = vld [vmem:[#allocation11 + $0x8] sm:$0xff]  }
 0x163   :  { %v345_v35 = vpop.f32.mrb[2].mxu1  ;;  %v253_v40 = vpop.f32.mrb[2].mxu0  ;;  %v1094_v39 = vld [vmem:[#allocation11 + $0x10] sm:$0xff]  }
 0x164   :  { %v349_v36 = vmul.f32 0.70710677, %v343_v33  ;;  %v960_v37 = vpop.f32.mrb[3].mxu1  ;;  %v940_v41 = vpop.f32.mrb[3].mxu0  ;;  %v348_v43 = vmul.f32 0.5, %v343_v33  ;;  %v1095_v40 = vld [vmem:[#allocation11 + $0x18] sm:$0xff]  }
 0x165   :  { %v1092_v37 = vld [vmem:[#allocation11] sm:$0xff]  }
 0x166   :  { %1100 = verf.f32 %v349_v36  ;;  %v1096_v41 = vld [vmem:[#allocation11 + $0x20] sm:$0xff]  }
 0x170   :  { %v1101_v42 = vpop.eup %1100 }
 0x171   :  { %v351_v44 = vadd.f32 1.0, %v1101_v42  ;;  %v1097_v42 = vld [vmem:[#allocation11 + $0x28] sm:$0xff]  }
 0x173   :  { %v352_v45 = vmul.f32 %v351_v44, %v348_v43  ;;  %v1098_v43 = vld [vmem:[#allocation11 + $0x30] sm:$0xff]   ;;  %v1099_v44 = vld [vmem:[#allocation11 + $0x38] sm:$0xff]  }
 0x175   :  { %v353_v46 = vpack.c.bf16 %v352_v45, %v352_v45  ;;  %v590_v45 = vsub.s32 4, %v1480_v28 }
 0x177   :  { %978 = vmatmul.mubr.bf16.vlgmr.msra.gmra.mrb[4].mxu0 %v353_v46  ;;  %v591_v46 = vrot.slane %v1486_v30, %v590_v45 }
 0x178   :  { %1017 = vmatprep.mubr.msk.bf16.mxu0 %vm1285_vm0, %v1284_v0  ;;  %1002 = vmatpush3.bf16.msra.mxu0 %v1084_v55 }
 0x179   :  { %1003 = vmatprep.subr.bf16.mxu0 %v1284_v0 }
 0x17c   :  { %1004 = vmatpush3.bf16.msra.mxu0 %v1085_v56 }
 0x17d   :  { %1005 = vmatprep.subr.bf16.mxu0 %v1284_v0 }
 0x180   :  { %1006 = vmatpush3.bf16.msra.mxu0 %v1086_v57 }
 0x181   :  { %1007 = vmatprep.subr.bf16.mxu0 %v1284_v0 }
 0x184   :  { %1008 = vmatpush3.bf16.msra.mxu0 %v1087_v17 }
 0x185   :  { %1009 = vmatprep.subr.bf16.mxu0 %v1284_v0 }
 0x188   :  { %1010 = vmatpush3.bf16.msra.mxu0 %v1088_v18 }
 0x189   :  { %1011 = vmatprep.subr.bf16.mxu0 %v1284_v0 }
 0x18c   :  { %1012 = vmatpush3.bf16.msra.mxu0 %v1089_v19 }
 0x18d   :  { %1013 = vmatprep.subr.bf16.mxu0 %v1284_v0 }
 0x190   :  { %1014 = vmatpush3.bf16.msra.mxu0 %v1090_v20 }
 0x191   :  { %1015 = vmatprep.subr.bf16.mxu0 %v1284_v0 }
 0x194   :  { %1016 = vmatpush3.bf16.msra.mxu0 %v1091_v21 }
 0x24a   :  { %v440_v60 = vpop.f32.mrb[4].mxu0 }
 0x24b   :  { %v441_v61 = vadd.f32 %v440_v60, %v357_v59  ;;  %v979_v62 = vpop.f32.mrb[5].mxu0 }
 0x24c   :  { %v443_v63 = vpop.f32.mrb[6].mxu0 }
 0x24d   :  { %v447_v1 = vmul.f32 0.70710677, %v441_v61  ;;  %v980_v2 = vpop.f32.mrb[7].mxu0  ;;  %v446_v6 = vmul.f32 0.5, %v441_v61  ;;  %v710_v63 = vsub.s32 5, %v1480_v28 }
 0x24f   :  { %1102 = verf.f32 %v447_v1  ;;  %v711_v1 = vrot.slane %v1486_v30, %v710_v63 }
 0x259   :  { %v1103_v5 = vpop.eup %1102 }
 0x25a   :  { %v449_v7 = vadd.f32 1.0, %v1103_v5 }
 0x25c   :  { %v450_v9 = vmul.f32 %v449_v7, %v446_v6 }
 0x25e   :  { %v451_v10 = vadd.f32 %v450_v9, %v251_v8 }
 0x260   :  { %v453_v11 = vmul.f32 0.70710677, %v451_v10  ;;  %v452_v13 = vmul.f32 0.5, %v451_v10 }
 0x262   :  { %1104 = verf.f32 %v453_v11 }
 0x26c   :  { %v1105_v12 = vpop.eup %1104 }
 0x26d   :  { %v455_v14 = vadd.f32 1.0, %v1105_v12 }
 0x26f   :  { %v1506_v15 = vmul.f32 %v455_v14, %v452_v13 }
 0x271   :  { %v457_v16 = vpack.c.bf16 %v1506_v15, %v1506_v15 }
 0x273   :  { %998 = vmatmul.mubr.bf16.vlgmr.msra.gmra.mrb[4].mxu1 %v457_v16 }
 0x274   :  { %1037 = vmatprep.mubr.msk.bf16.mxu1 %vm1285_vm0, %v1284_v0  ;;  %1022 = vmatpush3.bf16.msra.mxu1 %v1092_v37 }
 0x275   :  { %1023 = vmatprep.subr.bf16.mxu1 %v1284_v0 }
 0x278   :  { %1024 = vmatpush3.bf16.msra.mxu1 %v1093_v38 }
 0x279   :  { %1025 = vmatprep.subr.bf16.mxu1 %v1284_v0 }
 0x27c   :  { %1026 = vmatpush3.bf16.msra.mxu1 %v1094_v39 }
 0x27d   :  { %1027 = vmatprep.subr.bf16.mxu1 %v1284_v0 }
 0x280   :  { %1028 = vmatpush3.bf16.msra.mxu1 %v1095_v40 }
 0x281   :  { %1029 = vmatprep.subr.bf16.mxu1 %v1284_v0 }
 0x284   :  { %1030 = vmatpush3.bf16.msra.mxu1 %v1096_v41 }
 0x285   :  { %1031 = vmatprep.subr.bf16.mxu1 %v1284_v0 }
 0x288   :  { %1032 = vmatpush3.bf16.msra.mxu1 %v1097_v42 }
 0x289   :  { %1033 = vmatprep.subr.bf16.mxu1 %v1284_v0 }
 0x28c   :  { %1034 = vmatpush3.bf16.msra.mxu1 %v1098_v43 }
 0x28d   :  { %1035 = vmatprep.subr.bf16.mxu1 %v1284_v0 }
 0x290   :  { %1036 = vmatpush3.bf16.msra.mxu1 %v1099_v44 }
 0x346   :  { %v576_v24 = vpop.f32.mrb[4].mxu1 }
 0x347   :  { %v577_v25 = vadd.f32 %v576_v24, %v493_v23  ;;  %v999_v26 = vpop.f32.mrb[5].mxu1 }
 0x348   :  { %v579_v27 = vpop.f32.mrb[6].mxu1 }
 0x349   :  { %v583_v29 = vmul.f32 0.70710677, %v577_v25  ;;  %v1000_v31 = vpop.f32.mrb[7].mxu1  ;;  %v582_v33 = vmul.f32 0.5, %v577_v25 }
 0x34b   :  { %1106 = verf.f32 %v583_v29 }
 0x355   :  { %v1107_v32 = vpop.eup %1106 }
 0x356   :  { %v585_v34 = vadd.f32 1.0, %v1107_v32 }
 0x358   :  { %v586_v35 = vmul.f32 %v585_v34, %v582_v33 }
 0x35a   :  { %v587_v36 = vpack.c.bf16 %v586_v35, %v586_v35 }
 0x35c   :  { %1018 = vmatmul.mubr.bf16.vlgmr.msra.gmra.mrb[8].mxu0 %v587_v36 }
 0x42f   :  { %v674_v47 = vpop.f32.mrb[8].mxu0 }
 0x430   :  { %v675_v48 = vadd.f32 %v674_v47, %v591_v46  ;;  %v1019_v49 = vpop.f32.mrb[9].mxu0 }
 0x431   :  { %v677_v50 = vpop.f32.mrb[10].mxu0 }
 0x432   :  { %v681_v51 = vmul.f32 0.70710677, %v675_v48  ;;  %v1020_v52 = vpop.f32.mrb[11].mxu0  ;;  %v680_v54 = vmul.f32 0.5, %v675_v48 }
 0x434   :  { %1108 = verf.f32 %v681_v51 }
 0x43e   :  { %v1109_v53 = vpop.eup %1108 }
 0x43f   :  { %v683_v55 = vadd.f32 1.0, %v1109_v53 }
 0x441   :  { %v684_v56 = vmul.f32 %v683_v55, %v680_v54 }
 0x443   :  { %v685_v57 = vadd.f32 %v684_v56, %v1506_v15 }
 0x445   :  { %v687_v58 = vmul.f32 0.70710677, %v685_v57  ;;  %v686_v59 = vmul.f32 0.5, %v685_v57 }
 0x447   :  { %1110 = verf.f32 %v687_v58 }
 0x451   :  { %v1111_v0 = vpop.eup %1110 }
 0x452   :  { %v689_v60 = vadd.f32 1.0, %v1111_v0 }
 0x454   :  { %v690_v61 = vmul.f32 %v689_v60, %v686_v59 }
 0x456   :  { %v707_v62 = vpack.c.bf16 %v690_v61, %v690_v61 }
 0x458   :  { %1038 = vmatmul.mubr.bf16.vlgmr.msra.gmra.mrb[8].mxu1 %v707_v62 }
 0x52b   :  { %v794_v2 = vpop.f32.mrb[8].mxu1 }
 0x52c   :  { %v795_v3 = vadd.f32 %v794_v2, %v711_v1  ;;  %v1039_v4 = vpop.f32.mrb[9].mxu1 }
 0x52d   :  { %v797_v5 = vpop.f32.mrb[10].mxu1 }
 0x52e   :  { %800 = vst [vmem:[#allocation13] sm:$0xff] %v795_v3  ;;  %v1040_v6 = vpop.f32.mrb[11].mxu1 }
 0x52f   :  { %1255 = shalt.err (!%p1252_p10)
}
 0x530   :  { %s1256_s14 = scalar_lea.hbm %s1550_s8, 128 }
 0x531   :  { %p1257_p11 = scmp.ne.s32.totalorder %s1550_s8, %s1256_s14  ;;  %p1260_p12 = scmp.lt.u32.totalorder %s1256_s14, %s1550_s8 }
 0x533   :  { %p1262_p13 = pnand %p1260_p12, %p1257_p11 }
 0x535   :  { %1265 = shalt.err (!%p1262_p13)
}
 0x536   :  { %810 = dma.vmem_to_hbm [thread:$0]  %s808_s9, 128, %s1550_s8, [#allocation4]  }
 0x537   :  { %1274 = dma.done.wait [#allocation4], 128  }
 0x538   :  { %1275 = vsyncadd [#allocation4], 4294967168 }
 0x539   :  { %814 = vsyncpa [#allocation3], 1 }
 0x53a   :  { %815 = vsyncpa [#allocation6], 1 }
 0x53b   :  { %816 = vsyncpa [#allocation9], 1 }
 0x53c   :  { %817 = vsyncpa [#allocation12], 1 }
 0x53d   :  { %818 = vsyncpa [#allocation4], 1 }

</bundles_post_ra>
